<compile_context>
chip_gen: v7x
topology: tpu7x:2x2x1
jax: 0.10.0
libtpu: 0.0.40
codegen_flags: <defaults>
</compile_context>

<pallas_src>
import jax
import jax.numpy as jnp
from jax.experimental import pallas as pl
from jax.experimental.pallas import tpu as pltpu


def _round_up(x, m):
    return ((x + m - 1) // m) * m


def _logreg_kernel(x_ref, w_ref, b_ref, o_ref):
    # x_ref: (2, TR, 128) f32 VMEM  (feature-major, sublane/lane dense)
    # w_ref: (2,) f32 SMEM,  b_ref: (1,) f32 SMEM
    # o_ref: (TR, 128) f32 VMEM
    x0 = x_ref[0]                       # (TR, 128)
    x1 = x_ref[1]                       # (TR, 128)
    # Linear(2 -> 1) on the VPU: two scalar-broadcast FMAs, no MXU.
    z = x0 * w_ref[0] + x1 * w_ref[1] + b_ref[0]
    # Exact sigmoid with a single EUP transcendental: sigmoid(z) = 0.5*tanh(z/2) + 0.5
    o_ref[...] = (0.5 * jnp.tanh(0.5 * z) + 0.5).astype(o_ref.dtype)


def logistic_regression(x, weight, bias, *, max_block_rows=2048, target_steps=4):
    """x: (N, 2) f32, weight: (1, 2) f32, bias: (1,) f32 -> (N, 1) f32."""
    n, d = x.shape
    assert d == 2, "LogisticRegression expects 2 input features"
    x = x.astype(jnp.float32)
    w_flat = weight.reshape(-1).astype(jnp.float32)      # (2,)
    b_flat = bias.reshape(-1).astype(jnp.float32)        # (1,)

    # Row tiling of the (R, 128) lane-dense view.  Aim for >= target_steps grid
    # steps (keeps both v7x TensorCores busy) but cap the tile so per-step VMEM
    # (2 MiB in + 1 MiB out, double-buffered ~ 6 MiB) fits every generation's
    # scoped-VMEM default, while each step still moves ~3 MiB of HBM traffic.
    max_block_rows = max(8, _round_up(max_block_rows, 8))
    rows = pl.cdiv(n, 128)
    tr = max(8, min(max_block_rows, _round_up(pl.cdiv(rows, target_steps), 8)))
    rows_pad = _round_up(rows, tr)
    n_pad = rows_pad * 128

    # Feature-major, fully dense (2, rows_pad, 128) view of the input.
    # TODO(synk): the transpose (and pad for unaligned N) is one extra XLA pass
    # over x; an in-kernel deinterleave of the natural (N, 2) layout
    # (roll + lane select on the XLU) would remove it entirely.
    xt = x.T                                              # (2, n)
    if n_pad != n:
        xt = jnp.pad(xt, ((0, 0), (0, n_pad - n)))        # pad only when needed
    xt = xt.reshape(2, rows_pad, 128)

    out = pl.pallas_call(
        _logreg_kernel,
        out_shape=jax.ShapeDtypeStruct((rows_pad, 128), jnp.float32),
        grid=(rows_pad // tr,),
        in_specs=[
            pl.BlockSpec((2, tr, 128), lambda i: (0, i, 0)),            # x tile
            pl.BlockSpec(memory_space=pltpu.MemorySpace.SMEM),          # weight
            pl.BlockSpec(memory_space=pltpu.MemorySpace.SMEM),          # bias
        ],
        out_specs=pl.BlockSpec((tr, 128), lambda i: (i, 0)),
        compiler_params=pltpu.CompilerParams(
            dimension_semantics=("parallel",)),
    )(xt, w_flat, b_flat)

    # Dense flat output; (N, 1) view is a free reshape when N is tile-aligned.
    flat = out.reshape(n_pad)
    if n_pad != n:
        flat = flat[:n]
    return flat.reshape(n, 1)


if __name__ == "__main__":
    key = jax.random.PRNGKey(0)
    kx0, kx1, kw, kb = jax.random.split(key, 4)

    # Synthetic data mirroring the PyTorch script: two Gaussian blobs in R^2.
    n_per = 100
    x0 = 2.0 + jax.random.normal(kx0, (n_per, 2), dtype=jnp.float32)
    x1 = -2.0 + jax.random.normal(kx1, (n_per, 2), dtype=jnp.float32)
    x = jnp.concatenate([x0, x1], axis=0)                 # (200, 2) f32

    # Deterministic parameter init (nn.Linear(2, 1)): U(-1/sqrt(2), 1/sqrt(2)).
    bound = 1.0 / (2.0 ** 0.5)
    weight = jax.random.uniform(kw, (1, 2), jnp.float32, -bound, bound)
    bias = jax.random.uniform(kb, (1,), jnp.float32, -bound, bound)

    out = jax.block_until_ready(logistic_regression(x, weight, bias))

    # Cross-check against plain JAX reference (exact sigmoid -> tight tolerance).
    ref = jax.nn.sigmoid(x @ weight.T + bias[None, :])
    assert out.shape == (200, 1)
    assert jnp.allclose(out, ref, atol=1e-5, rtol=1e-5), float(
        jnp.max(jnp.abs(out - ref)))

    print("KERNEL_OK")
</pallas_src>

<mosaic_0001>
module attributes {stable_mosaic.version = 11 : i64} {
  func.func @_logreg_kernel(%arg0: i32, %arg1: memref<2x8x128xf32, #tpu.memory_space<vmem>>, %arg2: memref<2xf32, #tpu.memory_space<smem>>, %arg3: memref<1xf32, #tpu.memory_space<smem>>, %arg4: memref<8x128xf32, #tpu.memory_space<vmem>>) attributes {dimension_semantics = [#tpu.dimension_semantics<parallel>], iteration_bounds = array<i64: 1>, scalar_prefetch = 0 : i64, scratch_operands = 0 : i64, tpu.core_type = #tpu.core_type<tc>, window_params = [{transform_indices = @transform_0, window_bounds = array<i64: 2, 8, 128>}, {transform_indices = @transform_1, window_bounds = array<i64: 2>}, {transform_indices = @transform_2, window_bounds = array<i64: 1>}, {transform_indices = @transform_3, window_bounds = array<i64: 8, 128>}]} {
    %c0 = arith.constant 0 : index
    %c0_0 = arith.constant 0 : index
    %c0_1 = arith.constant 0 : index
    %0 = vector.load %arg1[%c0, %c0_0, %c0_1] : memref<2x8x128xf32, #tpu.memory_space<vmem>>, vector<1x8x128xf32>
    %1 = vector.shape_cast %0 : vector<1x8x128xf32> to vector<8x128xf32>
    %c1 = arith.constant 1 : index
    %c0_2 = arith.constant 0 : index
    %c0_3 = arith.constant 0 : index
    %2 = vector.load %arg1[%c1, %c0_2, %c0_3] : memref<2x8x128xf32, #tpu.memory_space<vmem>>, vector<1x8x128xf32>
    %3 = vector.shape_cast %2 : vector<1x8x128xf32> to vector<8x128xf32>
    %c0_4 = arith.constant 0 : index
    %4 = memref.load %arg2[%c0_4] : memref<2xf32, #tpu.memory_space<smem>>
    %5 = vector.broadcast %4 : f32 to vector<8x128xf32>
    %6 = arith.mulf %1, %5 : vector<8x128xf32>
    %c1_5 = arith.constant 1 : index
    %7 = memref.load %arg2[%c1_5] : memref<2xf32, #tpu.memory_space<smem>>
    %8 = vector.broadcast %7 : f32 to vector<8x128xf32>
    %9 = arith.mulf %3, %8 : vector<8x128xf32>
    %10 = arith.addf %6, %9 : vector<8x128xf32>
    %c0_6 = arith.constant 0 : index
    %11 = memref.load %arg3[%c0_6] : memref<1xf32, #tpu.memory_space<smem>>
    %12 = vector.broadcast %11 : f32 to vector<8x128xf32>
    %13 = arith.addf %10, %12 : vector<8x128xf32>
    %cst = arith.constant 5.000000e-01 : f32
    %14 = vector.broadcast %cst : f32 to vector<8x128xf32>
    %15 = arith.mulf %14, %13 : vector<8x128xf32>
    %16 = math.tanh %15 : vector<8x128xf32>
    %cst_7 = arith.constant 5.000000e-01 : f32
    %17 = vector.broadcast %cst_7 : f32 to vector<8x128xf32>
    %18 = arith.mulf %17, %16 : vector<8x128xf32>
    %cst_8 = arith.constant 5.000000e-01 : f32
    %19 = vector.broadcast %cst_8 : f32 to vector<8x128xf32>
    %20 = arith.addf %18, %19 : vector<8x128xf32>
    %c0_9 = arith.constant 0 : index
    %c0_10 = arith.constant 0 : index
    %21 = vector.load %arg4[%c0_9, %c0_10] : memref<8x128xf32, #tpu.memory_space<vmem>>, vector<8x128xf32>
    tpu.vector_store %arg4[%c0_9, %c0_10], %20 {strides = array<i32>} : memref<8x128xf32, #tpu.memory_space<vmem>>, vector<8x128xf32>,
    return
  }
  func.func @transform_0(%arg0: i32) -> (i32, i32, i32) {
    %c0_i32 = arith.constant 0 : i32
    %c0_i32_0 = arith.constant 0 : i32
    %c0_i32_1 = arith.constant 0 : i32
    return %c0_i32, %arg0, %c0_i32_0 : i32, i32, i32
  }
  func.func @transform_1(%arg0: i32) -> i32 {
    %c0_i32 = arith.constant 0 : i32
    %c0_i32_0 = arith.constant 0 : i32
    return %c0_i32 : i32
  }
  func.func @transform_2(%arg0: i32) -> i32 {
    %c0_i32 = arith.constant 0 : i32
    %c0_i32_0 = arith.constant 0 : i32
    return %c0_i32 : i32
  }
  func.func @transform_3(%arg0: i32) -> (i32, i32) {
    %c0_i32 = arith.constant 0 : i32
    %c0_i32_0 = arith.constant 0 : i32
    return %arg0, %c0_i32 : i32, i32
  }
}

</mosaic_0001>

<bundles_post_ra>
// kernel: tpu_custom_call.1
= control target key start
LH: loop header
LB: loop body
LE: loop exit
PB: predicated region body
PF: predicated region fallthrough
CT: control target
= control target key end

     0   :  { %9 = vsyncpa [#allocation4], 0  ;;  %s202_s0 = inlined_call_operand.hbm [shape: f32[2,8,128], index: 0, kind: input, shape index: {}]   ;;  %s203_s1 = inlined_call_operand.vmem [shape: f32[2], index: 1, kind: input, shape index: {}]   ;;  %s204_s2 = inlined_call_operand.<no memory space> [shape: f32[1], index: 2, kind: input, shape index: {}]   ;;  %s205_s3 = inlined_call_operand.hbm [shape: f32[8,128], index: 3, kind: output, shape index: {}]  }
   0x1   :  { %10 = vsyncpa [#allocation6], 0 }
   0x2   :  { %11 = vsyncpa [#allocation5], 0  ;;  %s147_s12 = smov [#allocation3]   ;;  %s30_s16 = sshll.u32 %s203_s1, 4  ;;  %s31_s16 = int_to_ptr.vmem [resolvable:$true] %s30_s16 }
   0x3   :  { %s17_s13 = sshll.u32 %s147_s12, 4  ;;  %s85_s19 = scalar_lea.hbm %s202_s0, 256  ;;  %s18_s13 = int_to_ptr.vmem [resolvable:$true] %s17_s13 }
   0x4   :  { %p86_p0 = scmp.ne.s32.totalorder %s202_s0, %s85_s19  ;;  %p89_p1 = scmp.lt.u32.totalorder %s85_s19, %s202_s0 }
   0x6   :  { %p91_p2 = pnand %p89_p1, %p86_p0 }
   0x8   :  { %94 = shalt.err (!%p91_p2)
}
   0x9   :  { %s95_s24 = scalar_lea.vmem %s18_s13, 256  ;;  %p100_p4 = scmp.lt.s32.totalorder %s18_s13, %s18_s13 }
   0xa   :  { %p96_p3 = scmp.ne.s32.totalorder %s18_s13, %s95_s24  ;;  %p101_p5 = scmp.lt.s32.totalorder %s95_s24, %s95_s24 }
   0xc   :  { %p102_p6 = por %p101_p5, %p100_p4 }
   0xe   :  { %p103_p7 = pnand %p102_p6, %p96_p3 }
  0x10   :  { %106 = shalt.err (!%p103_p7)
}
  0x11   :  { %s148_s1 = smov 128   ;;  %s149_s25 = smov 8  }
  0x12   :  { %23 = dma.hbm_to_vmem [thread:$0]  %s202_s0, 256, %s18_s13, [#allocation4], %s148_s1, %s148_s1, %s149_s25  }
  0x13   :  { %s107_s28 = scalar_lea.vmem %s31_s16, 16  ;;  %p112_p9 = scmp.lt.s32.totalorder %s31_s16, %s31_s16 }
  0x14   :  { %p108_p8 = scmp.ne.s32.totalorder %s31_s16, %s107_s28  ;;  %p113_p10 = scmp.lt.s32.totalorder %s107_s28, %s107_s28 }
  0x16   :  { %p114_p11 = por %p113_p10, %p112_p9 }
  0x18   :  { %p115_p12 = pnand %p114_p11, %p108_p8 }
  0x1a   :  { %118 = shalt.err (!%p115_p12)
}
  0x1b   :  { %s150_s29 = smov [#allocation7]  }
  0x1c   :  { %33 = dma.vmem_to_smem %s31_s16, 16, %s150_s29, [#allocation6]  }
  0x1d   :  { %141 = dma.done.wait [#allocation4], 256  }
  0x1e   :  { %142 = vsyncadd [#allocation4], 4294967040 }
  0x1f   :  { %143 = dma.done.wait [#allocation6], 16  }
  0x20   :  { %144 = vsyncadd [#allocation6], 4294967280 }
  0x21   :  { %42 = sfence }
  0x22   :  { %s46_s30 = sld [smem:[#allocation7]]  ;;  %s77_s4 = sld [smem:[#allocation7 + $0x1]]  ;;  %v43_v0 = vld [vmem:[#allocation3] sm:$0xff]  ;;  %v45_v1 = vld [vmem:[#allocation3 + $0x8] sm:$0xff]  ;;  %v54_v6 = vstv %s204_s2 }
  0x23   :  { %s151_s6 = smov [#allocation8]  }
  0x24   :  { %s67_s7 = sshll.u32 %s151_s6, 4  ;;  %s68_s7 = int_to_ptr.vmem [resolvable:$true] %s67_s7 }
  0x25   :  { %s119_s8 = scalar_lea.vmem %s68_s7, 128  ;;  %p124_p0 = scmp.lt.s32.totalorder %s68_s7, %s68_s7 }
  0x26   :  { %p120_p13 = scmp.ne.s32.totalorder %s68_s7, %s119_s8  ;;  %p125_p1 = scmp.lt.s32.totalorder %s119_s8, %s119_s8 }
  0x28   :  { %v47_v2 = vstv %s46_s30  ;;  %v50_v3 = vstv %s77_s4  ;;  %p126_p2 = por %p125_p1, %p124_p0 }
  0x29   :  { %v48_v4 = vmul.f32 %v47_v2, %v43_v0  ;;  %v51_v5 = vmul.f32 %v50_v3, %v45_v1 }
  0x2a   :  { %p127_p3 = pnand %p126_p2, %p120_p13 }
  0x2b   :  { %v52_v7 = vadd.f32 %v51_v5, %v48_v4 }
  0x2d   :  { %v55_v8 = vadd.f32 %v54_v6, %v52_v7 }
  0x2f   :  { %v56_v9 = vmul.f32 0.5, %v55_v8 }
  0x31   :  { %83 = vtanh.f32 %v56_v9 }
  0x3b   :  { %v84_v10 = vpop.eup %83 }
  0x3c   :  { %v58_v11 = vmul.f32 0.5, %v84_v10 }
  0x3e   :  { %v59_v12 = vadd.f32 0.5, %v58_v11 }
  0x40   :  { %60 = vst [vmem:[#allocation8] sm:$0xff] %v59_v12 }
  0x41   :  { %130 = shalt.err (!%p127_p3)
}
  0x42   :  { %s131_s10 = scalar_lea.hbm %s205_s3, 128 }
  0x43   :  { %p132_p4 = scmp.ne.s32.totalorder %s205_s3, %s131_s10  ;;  %p135_p5 = scmp.lt.u32.totalorder %s131_s10, %s205_s3 }
  0x45   :  { %p137_p6 = pnand %p135_p5, %p132_p4 }
  0x47   :  { %140 = shalt.err (!%p137_p6)
}
  0x48   :  { %70 = dma.vmem_to_hbm [thread:$0]  %s68_s7, 128, %s205_s3, [#allocation5]  }
  0x49   :  { %145 = dma.done.wait [#allocation5], 128  }
  0x4a   :  { %146 = vsyncadd [#allocation5], 4294967168 }
  0x4b   :  { %74 = vsyncpa [#allocation4], 1 }
  0x4c   :  { %75 = vsyncpa [#allocation5], 1 }
  0x4d   :  { %76 = vsyncpa [#allocation6], 1 }

</bundles_post_ra>
